<compile_context>
chip_gen: v6e
topology: v6e:2x2x1
jax: 0.10.0
libtpu: 0.0.40
codegen_flags: <defaults>
</compile_context>

<pallas_src>
import jax
import jax.numpy as jnp
from jax.experimental import pallas as pl
from jax.experimental.pallas import tpu as pltpu


def _mlp_kernel(x_ref, w1_ref, b1_ref, w2_ref, b2_ref, w3_ref, b3_ref, o_ref):
    # Feature-major fused MLP: batch on the lane axis.
    # x tile (tb, D) -> (D, tb) via the XLU, then cast only the MXU operands
    # (bf16 by default); accumulate / bias / ReLU stay f32 on the VPU.
    xt = x_ref[...].T.astype(w1_ref.dtype)                            # (D, tb)
    h1 = jnp.dot(w1_ref[...], xt,
                 preferred_element_type=jnp.float32) + b1_ref[...]    # (64, tb)
    h1 = jnp.maximum(h1, 0.0)
    h2 = jnp.dot(w2_ref[...], h1.astype(w2_ref.dtype),
                 preferred_element_type=jnp.float32) + b2_ref[...]    # (32, tb)
    h2 = jnp.maximum(h2, 0.0)
    o_ref[...] = jnp.dot(w3_ref[...], h2.astype(w3_ref.dtype),
                         preferred_element_type=jnp.float32) + b3_ref[...]


def _vmem_limit_bytes():
    # Half of physical VMEM, capped: ~32 MiB on v7x (64 MiB/TC), ~64 MiB on
    # v5e/v6e (128 MiB).  Footprint here is tiny (<8 MiB) so this is headroom.
    try:
        cap = getattr(pltpu.get_tpu_info(), "vmem_capacity_bytes", None)
    except Exception:
        cap = None
    if not cap:
        cap = 64 * 1024 * 1024
    return int(min(cap // 2, 96 * 1024 * 1024))


def health_predictor_forward(x, params, *, tile_b=2048, compute_dtype=jnp.bfloat16):
    """x: (B, input_dim) float32. params: dict of w1,b1,w2,b2,w3,b3 (in,out)."""
    w1, b1, w2, b2, w3, b3 = (params["w1"], params["b1"], params["w2"],
                              params["b2"], params["w3"], params["b3"])
    B, D = x.shape
    h1_dim, h2_dim, out_dim = w1.shape[1], w2.shape[1], w3.shape[1]

    cdt = jnp.float32 if compute_dtype is None else compute_dtype
    # Pre-transpose weights to (out, in) and cast the MXU operands once; biases
    # become (out, 1) f32 columns (broadcast over the batch-on-lanes axis).
    w1t, w2t, w3t = (w.T.astype(cdt) for w in (w1, w2, w3))
    b1c = b1.reshape(h1_dim, 1).astype(jnp.float32)
    b2c = b2.reshape(h2_dim, 1).astype(jnp.float32)
    b3c = b3.reshape(out_dim, 1).astype(jnp.float32)

    # Batch tile = lane axis of the transposed output: multiple of 128 unless a
    # single full-extent block covers the whole batch.  No padding: grid uses
    # cdiv and Pallas drops OOB writes of the last partial block.
    tile_b = max(128, (tile_b // 128) * 128)
    tb = B if B <= tile_b else tile_b
    grid = (pl.cdiv(B, tb),)

    const = lambda a: pl.BlockSpec(a.shape, lambda i: (0,) * a.ndim)

    flops = 2 * B * (D * h1_dim + h1_dim * h2_dim + h2_dim * out_dim)
    bytes_accessed = (x.size * x.dtype.itemsize + B * out_dim * 4 +
                      sum(a.size * a.dtype.itemsize
                          for a in (w1t, b1c, w2t, b2c, w3t, b3c)))

    out_t = pl.pallas_call(
        _mlp_kernel,
        out_shape=jax.ShapeDtypeStruct((out_dim, B), jnp.float32),
        grid=grid,
        in_specs=[
            pl.BlockSpec((tb, D), lambda i: (i, 0)),   # x streamed over batch
            const(w1t), const(b1c), const(w2t), const(b2c), const(w3t), const(b3c),
        ],
        out_specs=pl.BlockSpec((out_dim, tb), lambda i: (0, i)),  # lane-dense
        compiler_params=pltpu.CompilerParams(
            dimension_semantics=("parallel",),          # batch axis independent
            vmem_limit_bytes=_vmem_limit_bytes()),
        cost_estimate=pl.CostEstimate(
            flops=flops, transcendentals=0, bytes_accessed=bytes_accessed),
    )(x, w1t, b1c, w2t, b2c, w3t, b3c)

    # (4, B) -> (B, 4): cheap layout plumbing outside the kernel.
    return out_t.T


def init_params(input_dim, key):
    """Linear(input_dim,64) -> Linear(64,32) -> Linear(32,4), PyTorch-style
    uniform(-1/sqrt(fan_in), 1/sqrt(fan_in)) init. Weights stored (in, out)."""
    dims = [(input_dim, 64), (64, 32), (32, 4)]
    params = {}
    keys = jax.random.split(key, 2 * len(dims))
    for i, (fan_in, fan_out) in enumerate(dims):
        bound = 1.0 / jnp.sqrt(jnp.float32(fan_in))
        params[f"w{i+1}"] = jax.random.uniform(
            keys[2 * i], (fan_in, fan_out), jnp.float32, -bound, bound)
        params[f"b{i+1}"] = jax.random.uniform(
            keys[2 * i + 1], (1, fan_out), jnp.float32, -bound, bound)
    return params


def reference_forward(x, params):
    h1 = jnp.maximum(x @ params["w1"] + params["b1"], 0.0)
    h2 = jnp.maximum(h1 @ params["w2"] + params["b2"], 0.0)
    return h2 @ params["w3"] + params["b3"]


if __name__ == "__main__":
    key = jax.random.PRNGKey(0)
    k_x, k_p, k_x2 = jax.random.split(key, 3)

    input_dim = 16
    params = init_params(input_dim, k_p)

    # Small case: single full-extent block, default bf16 MXU operands.
    batch = 8
    x = jax.random.normal(k_x, (batch, input_dim), jnp.float32)
    out = jax.block_until_ready(health_predictor_forward(x, params))
    ref = reference_forward(x, params)
    assert out.shape == (batch, 4)
    assert jnp.allclose(out, ref, atol=5e-2, rtol=5e-2)

    # Multi-block grid with a partial last block (no wrapper pad / slice),
    # exact f32 path for tight numerics: tile_b=128 -> grid=(3,), last block 44 rows.
    batch2 = 300
    x2 = jax.random.normal(k_x2, (batch2, input_dim), jnp.float32)
    out2 = jax.block_until_ready(
        health_predictor_forward(x2, params, tile_b=128, compute_dtype=None))
    ref2 = reference_forward(x2, params)
    assert out2.shape == (batch2, 4)
    assert jnp.allclose(out2, ref2, atol=1e-4, rtol=1e-4)

    # Same tiled path with the default bf16 MXU operands (f32 accumulate).
    out3 = jax.block_until_ready(
        health_predictor_forward(x2, params, tile_b=128))
    assert out3.shape == (batch2, 4)
    assert jnp.allclose(out3, ref2, atol=5e-2, rtol=5e-2)

    print("KERNEL_OK")
</pallas_src>

<mosaic_0001>
module attributes {stable_mosaic.version = 11 : i64} {
  func.func @_mlp_kernel(%arg0: i32, %arg1: memref<8x16xf32, #tpu.memory_space<vmem>>, %arg2: memref<64x16xbf16, #tpu.memory_space<vmem>>, %arg3: memref<64x1xf32, #tpu.memory_space<vmem>>, %arg4: memref<32x64xbf16, #tpu.memory_space<vmem>>, %arg5: memref<32x1xf32, #tpu.memory_space<vmem>>, %arg6: memref<4x32xbf16, #tpu.memory_space<vmem>>, %arg7: memref<4x1xf32, #tpu.memory_space<vmem>>, %arg8: memref<4x8xf32, #tpu.memory_space<vmem>>) attributes {dimension_semantics = [#tpu.dimension_semantics<parallel>], iteration_bounds = array<i64: 1>, scalar_prefetch = 0 : i64, scratch_operands = 0 : i64, tpu.core_type = #tpu.core_type<tc>, window_params = [{transform_indices = @transform_0, window_bounds = array<i64: 8, 16>}, {pipeline_mode = #tpu.pipeline_mode<synchronous>, transform_indices = @transform_1, window_bounds = array<i64: 64, 16>}, {pipeline_mode = #tpu.pipeline_mode<synchronous>, transform_indices = @transform_2, window_bounds = array<i64: 64, 1>}, {pipeline_mode = #tpu.pipeline_mode<synchronous>, transform_indices = @transform_3, window_bounds = array<i64: 32, 64>}, {pipeline_mode = #tpu.pipeline_mode<synchronous>, transform_indices = @transform_4, window_bounds = array<i64: 32, 1>}, {pipeline_mode = #tpu.pipeline_mode<synchronous>, transform_indices = @transform_5, window_bounds = array<i64: 4, 32>}, {pipeline_mode = #tpu.pipeline_mode<synchronous>, transform_indices = @transform_6, window_bounds = array<i64: 4, 1>}, {transform_indices = @transform_7, window_bounds = array<i64: 4, 8>}]} {
    %c0 = arith.constant 0 : index
    %c0_0 = arith.constant 0 : index
    %0 = vector.load %arg1[%c0, %c0_0] : memref<8x16xf32, #tpu.memory_space<vmem>>, vector<8x16xf32>
    %1 = tpu.transpose %0, [1, 0] : vector<8x16xf32> -> vector<16x8xf32>
    %2 = arith.truncf %1 : vector<16x8xf32> to vector<16x8xbf16>
    %c0_1 = arith.constant 0 : index
    %c0_2 = arith.constant 0 : index
    %3 = vector.load %arg2[%c0_1, %c0_2] : memref<64x16xbf16, #tpu.memory_space<vmem>>, vector<64x16xbf16>
    %cst = arith.constant dense<0.000000e+00> : vector<64x8xf32>
    %4 = tpu.matmul %3, %2, %cst {dimension_numbers = #tpu.dot_dimension_numbers<[1], [0], [0], [1], [0, 0, 1, 1], [], []>} : vector<64x16xbf16>, vector<16x8xbf16>, vector<64x8xf32> -> vector<64x8xf32>
    %c0_3 = arith.constant 0 : index
    %c0_4 = arith.constant 0 : index
    %5 = vector.load %arg3[%c0_3, %c0_4] : memref<64x1xf32, #tpu.memory_space<vmem>>, vector<64x1xf32>
    %6 = vector.broadcast %5 : vector<64x1xf32> to vector<64x8xf32>
    %7 = arith.addf %4, %6 : vector<64x8xf32>
    %cst_5 = arith.constant 0.000000e+00 : f32
    %8 = vector.broadcast %cst_5 : f32 to vector<64x8xf32>
    %9 = arith.maximumf %7, %8 : vector<64x8xf32>
    %c0_6 = arith.constant 0 : index
    %c0_7 = arith.constant 0 : index
    %10 = vector.load %arg4[%c0_6, %c0_7] : memref<32x64xbf16, #tpu.memory_space<vmem>>, vector<32x64xbf16>
    %11 = arith.truncf %9 : vector<64x8xf32> to vector<64x8xbf16>
    %cst_8 = arith.constant dense<0.000000e+00> : vector<32x8xf32>
    %12 = tpu.matmul %10, %11, %cst_8 {dimension_numbers = #tpu.dot_dimension_numbers<[1], [0], [0], [1], [0, 0, 1, 1], [], []>} : vector<32x64xbf16>, vector<64x8xbf16>, vector<32x8xf32> -> vector<32x8xf32>
    %c0_9 = arith.constant 0 : index
    %c0_10 = arith.constant 0 : index
    %13 = vector.load %arg5[%c0_9, %c0_10] : memref<32x1xf32, #tpu.memory_space<vmem>>, vector<32x1xf32>
    %14 = vector.broadcast %13 : vector<32x1xf32> to vector<32x8xf32>
    %15 = arith.addf %12, %14 : vector<32x8xf32>
    %cst_11 = arith.constant 0.000000e+00 : f32
    %16 = vector.broadcast %cst_11 : f32 to vector<32x8xf32>
    %17 = arith.maximumf %15, %16 : vector<32x8xf32>
    %c0_12 = arith.constant 0 : index
    %c0_13 = arith.constant 0 : index
    %18 = vector.load %arg6[%c0_12, %c0_13] : memref<4x32xbf16, #tpu.memory_space<vmem>>, vector<4x32xbf16>
    %19 = arith.truncf %17 : vector<32x8xf32> to vector<32x8xbf16>
    %cst_14 = arith.constant dense<0.000000e+00> : vector<4x8xf32>
    %20 = tpu.matmul %18, %19, %cst_14 {dimension_numbers = #tpu.dot_dimension_numbers<[1], [0], [0], [1], [0, 0, 1, 1], [], []>} : vector<4x32xbf16>, vector<32x8xbf16>, vector<4x8xf32> -> vector<4x8xf32>
    %c0_15 = arith.constant 0 : index
    %c0_16 = arith.constant 0 : index
    %21 = vector.load %arg7[%c0_15, %c0_16] : memref<4x1xf32, #tpu.memory_space<vmem>>, vector<4x1xf32>
    %22 = vector.broadcast %21 : vector<4x1xf32> to vector<4x8xf32>
    %23 = arith.addf %20, %22 : vector<4x8xf32>
    %c0_17 = arith.constant 0 : index
    %c0_18 = arith.constant 0 : index
    %24 = vector.load %arg8[%c0_17, %c0_18] : memref<4x8xf32, #tpu.memory_space<vmem>>, vector<4x8xf32>
    tpu.vector_store %arg8[%c0_17, %c0_18], %23 {strides = array<i32>} : memref<4x8xf32, #tpu.memory_space<vmem>>, vector<4x8xf32>,
    return
  }
  func.func @transform_0(%arg0: i32) -> (i32, i32) {
    %c0_i32 = arith.constant 0 : i32
    %c0_i32_0 = arith.constant 0 : i32
    return %arg0, %c0_i32 : i32, i32
  }
  func.func @transform_1(%arg0: i32) -> (i32, i32) {
    %c0_i32 = arith.constant 0 : i32
    %c0_i32_0 = arith.constant 0 : i32
    %c0_i32_1 = arith.constant 0 : i32
    return %c0_i32, %c0_i32_0 : i32, i32
  }
  func.func @transform_2(%arg0: i32) -> (i32, i32) {
    %c0_i32 = arith.constant 0 : i32
    %c0_i32_0 = arith.constant 0 : i32
    %c0_i32_1 = arith.constant 0 : i32
    return %c0_i32, %c0_i32_0 : i32, i32
  }
  func.func @transform_3(%arg0: i32) -> (i32, i32) {
    %c0_i32 = arith.constant 0 : i32
    %c0_i32_0 = arith.constant 0 : i32
    %c0_i32_1 = arith.constant 0 : i32
    return %c0_i32, %c0_i32_0 : i32, i32
  }
  func.func @transform_4(%arg0: i32) -> (i32, i32) {
    %c0_i32 = arith.constant 0 : i32
    %c0_i32_0 = arith.constant 0 : i32
    %c0_i32_1 = arith.constant 0 : i32
    return %c0_i32, %c0_i32_0 : i32, i32
  }
  func.func @transform_5(%arg0: i32) -> (i32, i32) {
    %c0_i32 = arith.constant 0 : i32
    %c0_i32_0 = arith.constant 0 : i32
    %c0_i32_1 = arith.constant 0 : i32
    return %c0_i32, %c0_i32_0 : i32, i32
  }
  func.func @transform_6(%arg0: i32) -> (i32, i32) {
    %c0_i32 = arith.constant 0 : i32
    %c0_i32_0 = arith.constant 0 : i32
    %c0_i32_1 = arith.constant 0 : i32
    return %c0_i32, %c0_i32_0 : i32, i32
  }
  func.func @transform_7(%arg0: i32) -> (i32, i32) {
    %c0_i32 = arith.constant 0 : i32
    %c0_i32_0 = arith.constant 0 : i32
    return %c0_i32, %arg0 : i32, i32
  }
}

</mosaic_0001>

<bundles_post_ra>
// kernel: tpu_custom_call.1
= control target key start
LH: loop header
LB: loop body
LE: loop exit
PB: predicated region body
PF: predicated region fallthrough
CT: control target
= control target key end

     0   :  { %s602_s0 = inlined_call_operand.vmem [shape: f32[8,16], index: 0, kind: input, shape index: {}]   ;;  %s603_s1 = inlined_call_operand.vmem [shape: bf16[64,16], index: 1, kind: input, shape index: {}]   ;;  %s604_s2 = inlined_call_operand.vmem [shape: f32[64,1], index: 2, kind: input, shape index: {}]   ;;  %s605_s3 = inlined_call_operand.vmem [shape: bf16[32,64], index: 3, kind: input, shape index: {}]   ;;  %s606_s4 = inlined_call_operand.vmem [shape: f32[32,1], index: 4, kind: input, shape index: {}]   ;;  %s607_s5 = inlined_call_operand.vmem [shape: bf16[4,32], index: 5, kind: input, shape index: {}]   ;;  %s608_s6 = inlined_call_operand.vmem [shape: f32[4,1], index: 6, kind: input, shape index: {}]   ;;  %s609_s7 = inlined_call_operand.hbm [shape: f32[4,8], index: 7, kind: output, shape index: {}]  }
   0x1   :  { %v28_v0 = vld [vmem:[%s602_s0] sm:$0xff] }
   0x2   :  { %29 = vxpose.xlu0.b32.start.end [1/1] (short) (narrow) %v28_v0, 16 }
   0x3   :  { %12 = vsyncpa [#allocation3], 0  ;;  %v458_v1 = vld [vmem:[%s603_s1] sm:$0xff]   ;;  %vm138_vm0 = vcmask 130048   ;;  %v77_v2 = vld [vmem:[%s604_s2 + $0x38] sm:$0xff]  ;;  %v486_v3 = vmov 0  }
   0x4   :  { %424 = vmatprep.mubr.msk.bf16.mxu0 %vm138_vm0, %v458_v1  ;;  %457 = vset.pattern.permute.xlu1 %v486_v3  ;;  %v74_v4 = vld [vmem:[%s604_s2 + $0x20] sm:$0xff]  ;;  %v75_v5 = vld [vmem:[%s604_s2 + $0x28] sm:$0xff]  ;;  %v72_v6 = vld [vmem:[%s604_s2 + $0x10] sm:$0xff]  ;;  %vm266_vm1 = vcmask 523264   ;;  %v487_v60 = vmov 0.0   ;;  %vm488_vm2 = vmmov 0  }
   0x5   :  { %115 = vperm.xlu1 %457, %v77_v2   ;;  %v73_v7 = vld [vmem:[%s604_s2 + $0x18] sm:$0xff]  ;;  %v70_v8 = vld [vmem:[%s604_s2] sm:$0xff]  ;;  %v71_v9 = vld [vmem:[%s604_s2 + $0x8] sm:$0xff]  ;;  %vm335_vm3 = vcmask 261120   ;;  %s489_s13 = smov [#allocation2]   ;;  %vm379_vm4 = vcmask 60416  }
   0x6   :  { %v234_v10 = vld [vmem:[%s606_s4 + $0x10] sm:$0xff]  ;;  %v235_v12 = vld [vmem:[%s606_s4 + $0x18] sm:$0xff]  ;;  %v232_v13 = vld [vmem:[%s606_s4] sm:$0xff]  ;;  %s387_s14 = sshll.u32 %s489_s13, 4  ;;  %s388_s14 = int_to_ptr.vmem [resolvable:$true] %s387_s14 }
   0x7   :  { %v76_v11 = vld [vmem:[%s604_s2 + $0x30] sm:$0xff]  ;;  %v233_v14 = vld [vmem:[%s606_s4 + $0x8] sm:$0xff]  ;;  %v329_v15 = vld [vmem:[%s608_s6] sm:$0xf]  ;;  %s464_s15 = scalar_lea.vmem %s388_s14, 64  ;;  %p469_p1 = scmp.lt.s32.totalorder %s388_s14, %s388_s14 }
   0x8   :  { %v459_v19 = vld [vmem:[%s603_s1 + $0x8] sm:$0xff]   ;;  %v460_v20 = vld [vmem:[%s603_s1 + $0x10] sm:$0xff]   ;;  %v461_v21 = vld [vmem:[%s603_s1 + $0x18] sm:$0xff]   ;;  %p465_p0 = scmp.ne.s32.totalorder %s388_s14, %s464_s15  ;;  %p470_p2 = scmp.lt.s32.totalorder %s464_s15, %s464_s15 }
   0x9   :  { %100 = vperm.xlu1 %457, %v74_v4   ;;  %v462_v22 = vld [vmem:[%s605_s3] sm:$0xff]   ;;  %v463_v59 = vld [vmem:[%s605_s3 + $0x8] sm:$0xff]  }
   0xa   :  { %440 = vmatprep.mubr.msk.bf16.mxu1 %vm266_vm1, %v462_v22  ;;  %p471_p3 = por %p470_p2, %p469_p1 }
   0xc   :  { %p472_p4 = pnand %p471_p3, %p465_p0 }
   0xd   :  { %105 = vperm.xlu1 %457, %v75_v5  }
  0x11   :  { %90 = vperm.xlu1 %457, %v72_v6  }
  0x15   :  { %95 = vperm.xlu1 %457, %v73_v7  }
  0x19   :  { %80 = vperm.xlu1 %457, %v70_v8  }
  0x1d   :  { %85 = vperm.xlu1 %457, %v71_v9  }
  0x21   :  { %248 = vperm.xlu1 %457, %v234_v10  }
  0x25   :  { %253 = vperm.xlu1 %457, %v235_v12  }
  0x29   :  { %238 = vperm.xlu1 %457, %v232_v13  }
  0x2b   :  { %456 = vset.pattern.permute.xlu0 %v486_v3 }
  0x2d   :  { %243 = vperm.xlu1 %457, %v233_v14  }
  0x2f   :  { %110 = vperm.xlu0 %456, %v76_v11  }
  0x31   :  { %332 = vperm.xlu1 %457, %v329_v15   ;;  %v326_v15 = vld [vmem:[%s607_s5] sm:$0x3] }
  0x7e   :  { %v45_v16 = vpop.trf.xlu0 }
  0x80   :  { %v116_v23 = vpop.permute.xlu1 %115 }
  0x82   :  { %v46_v17 = vpop.trf.xlu0 }
  0x83   :  { %v61_v18 = vpack.c.bf16 %v46_v17, %v45_v16 }
  0x84   :  { %v101_v24 = vpop.permute.xlu1 %100 }
  0x85   :  { %422 = vmatprep.subr.bf16.mxu0 %v61_v18 }
  0x86   :  { %423 = vmatpush3.bf16.msra.mxu0 %v61_v18 }
  0x87   :  { %444 = vmatprep.subr.bf16.mxu0 %v487_v60 }
  0x88   :  { %v106_v25 = vpop.permute.xlu1 %105 }
  0x89   :  { %425 = vmatmul.mubr.msk.bf16.vlgmr.msra.gmra.mxu0 %vm138_vm0, %v459_v19 }
  0x8a   :  { %428 = vmatprep.mubr.msk.bf16.mxu0 %vm138_vm0, %v460_v20 }
  0x8c   :  { %v91_v26 = vpop.permute.xlu1 %90 }
  0x90   :  { %v96_v30 = vpop.permute.xlu1 %95 }
  0x91   :  { %429 = vmatmul.mubr.msk.bf16.gmra.mxu0 %vm138_vm0, %v461_v21 }
  0x92   :  { %448 = vmatprep.mubr.msk.bf16.mxu0 %vm488_vm2, %v487_v60 }
  0x94   :  { %v81_v36 = vpop.permute.xlu1 %80 }
  0x98   :  { %v86_v49 = vpop.permute.xlu1 %85 }
  0x9c   :  { %v249_v61 = vpop.permute.xlu1 %248 }
  0xa0   :  { %v254_v62 = vpop.permute.xlu1 %253 }
  0xa4   :  { %v239_v63 = vpop.permute.xlu1 %238 }
  0xa8   :  { %v244_v5 = vpop.permute.xlu1 %243 }
  0xaa   :  { %v111_v33 = vpop.permute.xlu0 %110 }
  0xac   :  { %v333_v16 = vpop.permute.xlu1 %332 }
 0x149   :  { %v426_v27 = vpop.f32.mrf.mxu0 }
 0x14a   :  { %v194_v45 = vadd.f32 %v426_v27, %v91_v26 }
 0x14b   :  { %v185_v28 = vpop.f32.mrf.mxu0 }
 0x14c   :  { %v218_v53 = vmax.f32 %v194_v45, 0.0  ;;  %v186_v54 = vadd.f32 %v185_v28, %v81_v36 }
 0x14d   :  { %v427_v29 = vpop.f32.mrf.mxu0 }
 0x14e   :  { %v197_v41 = vadd.f32 %v427_v29, %v96_v30  ;;  %v216_v57 = vmax.f32 %v186_v54, 0.0 }
 0x14f   :  { %v188_v31 = vpop.f32.mrf.mxu0 }
 0x150   :  { %v219_v50 = vmax.f32 %v197_v41, 0.0  ;;  %v189_v51 = vadd.f32 %v188_v31, %v86_v49 }
 0x151   :  { %v430_v32 = vpop.f32.mrf.mxu0 }
 0x152   :  { %v210_v35 = vadd.f32 %v430_v32, %v111_v33  ;;  %v229_v55 = vpack.c.bf16 %v219_v50, %v218_v53  ;;  %v217_v56 = vmax.f32 %v189_v51, 0.0 }
 0x153   :  { %v201_v34 = vpop.f32.mrf.mxu0 }
 0x154   :  { %v202_v38 = vadd.f32 %v201_v34, %v101_v24  ;;  %v222_v42 = vmax.f32 %v210_v35, 0.0  ;;  %v228_v58 = vpack.c.bf16 %v217_v56, %v216_v57 }
 0x155   :  { %v431_v37 = vpop.f32.mrf.mxu0 }
 0x156   :  { %v213_v39 = vadd.f32 %v431_v37, %v116_v23  ;;  %v220_v46 = vmax.f32 %v202_v38, 0.0 }
 0x157   :  { %v204_v40 = vpop.f32.mrf.mxu0 }
 0x158   :  { %v223_v43 = vmax.f32 %v213_v39, 0.0  ;;  %v205_v44 = vadd.f32 %v204_v40, %v106_v25 }
 0x15a   :  { %v221_v47 = vmax.f32 %v205_v44, 0.0  ;;  %v231_v48 = vpack.c.bf16 %v223_v43, %v222_v42 }
 0x15c   :  { %v230_v52 = vpack.c.bf16 %v221_v47, %v220_v46  ;;  %432 = vmatprep.subr.bf16.mxu1 %v231_v48 }
 0x15d   :  { %433 = vmatpush3.bf16.msra.mxu1 %v231_v48 }
 0x15e   :  { %434 = vmatprep.subr.bf16.mxu1 %v230_v52 }
 0x161   :  { %435 = vmatpush3.bf16.msra.mxu1 %v230_v52 }
 0x162   :  { %436 = vmatprep.subr.bf16.mxu1 %v229_v55 }
 0x165   :  { %437 = vmatpush3.bf16.msra.mxu1 %v229_v55 }
 0x166   :  { %438 = vmatprep.subr.bf16.mxu1 %v228_v58 }
 0x169   :  { %439 = vmatpush3.bf16.msra.mxu1 %v228_v58 }
 0x16c   :  { %441 = vmatmul.mubr.msk.bf16.vlgmr.msra.gmra.mxu1 %vm266_vm1, %v463_v59 }
 0x22c   :  { %v442_v0 = vpop.f32.mrf.mxu1 }
 0x22d   :  { %v316_v2 = vadd.f32 %v442_v0, %v249_v61 }
 0x22e   :  { %v307_v1 = vpop.f32.mrf.mxu1 }
 0x22f   :  { %v324_v7 = vmax.f32 %v316_v2, 0.0  ;;  %v308_v8 = vadd.f32 %v307_v1, %v239_v63 }
 0x230   :  { %v443_v3 = vpop.f32.mrf.mxu1 }
 0x231   :  { %v319_v4 = vadd.f32 %v443_v3, %v254_v62  ;;  %v322_v13 = vmax.f32 %v308_v8, 0.0 }
 0x232   :  { %v310_v6 = vpop.f32.mrf.mxu1 }
 0x233   :  { %v325_v9 = vmax.f32 %v319_v4, 0.0  ;;  %v311_v10 = vadd.f32 %v310_v6, %v244_v5 }
 0x235   :  { %v328_v11 = vpack.c.bf16 %v325_v9, %v324_v7  ;;  %v323_v12 = vmax.f32 %v311_v10, 0.0 }
 0x237   :  { %445 = vmatpush3.bf16.msra.mxu0 %v328_v11  ;;  %v327_v14 = vpack.c.bf16 %v323_v12, %v322_v13 }
 0x238   :  { %446 = vmatprep.subr.bf16.mxu0 %v487_v60 }
 0x23b   :  { %447 = vmatpush3.bf16.msra.mxu0 %v327_v14 }
 0x23e   :  { %449 = vmatmul.mubr.msk.bf16.vlgmr.msra.gmra.mxu0 %vm335_vm3, %v326_v15 }
 0x2fe   :  { %v373_v17 = vpop.f32.mrf.mxu0 }
 0x2ff   :  { %v374_v18 = vadd.f32 %v373_v17, %v333_v16 }
 0x300   :  { %v450_v19 = vpop.f32.mrf.mxu0 }
 0x301   :  { %380 = vst.msk [vmem:[#allocation2] sm:$0xf] %vm379_vm4, %v374_v18 }
 0x302   :  { %v376_v20 = vpop.f32.mrf.mxu0 }
 0x303   :  { %475 = shalt.err (!%p472_p4)
}
 0x304   :  { %390 = dma.vmem_to_hbm [thread:$0]  %s388_s14, 64, %s609_s7, [#allocation3]   ;;  %v451_v21 = vpop.f32.mrf.mxu0 }
 0x305   :  { %484 = dma.done.wait [#allocation3], 64  }
 0x306   :  { %485 = vsyncadd [#allocation3], 4294967232 }
 0x307   :  { %394 = vsyncpa [#allocation3], 1 }

</bundles_post_ra>
